<compile_context>
chip_gen: v7x
topology: tpu7x:2x2x1
jax: 0.10.0
libtpu: 0.0.40
codegen_flags: <defaults>
</compile_context>

<pallas_src>
import jax
import jax.numpy as jnp
from jax.experimental import pallas as pl
from jax.experimental.pallas import tpu as pltpu


# ----------------------------- Pallas kernel -----------------------------

def _fused_hetero_dirgnn_kernel(xraw_ref, wpre_ref, acat_ref, wproj_ref,
                                bcomb_ref, wlin_ref, blin_ref, o_ref):
    """Fused: pretransform -> stacked aggregation -> merged projections (+mean,
    +alpha mix, +skip) -> ReLU -> final Linear.  All rearrangement / constant
    folding happens once on the host; the kernel is four chained MXU matmuls."""
    # (1) per-node-type Linear + ReLU.  xraw/wpre are block-diagonal over the four
    #     message paths (fwd / bwd / context / root), so z holds each path's
    #     pretransformed features in its own HID-lane block (lane-dense 4*HID).
    z = jnp.dot(xraw_ref[...], wpre_ref[...], preferred_element_type=jnp.float32)
    z = jnp.maximum(z, 0.0)                                   # [3*NT + NC, 4*HID]

    # (2) all neighborhood aggregations (A_norm, A_t_norm, SAGE-mean) plus the
    #     identity/root path in ONE matmul against the stacked aggregation matrix.
    m = jnp.dot(acat_ref[...], z, preferred_element_type=jnp.float32)  # [NT, 4*HID]

    # (3) four HID x HID projections merged into a single K=4*HID matmul; alpha,
    #     (1-alpha), the HeteroConv 0.5-mean factor and the skip identity are
    #     pre-folded into wproj, the three biases into bcomb.  Then ReLU.
    h = jnp.dot(m, wproj_ref[...], preferred_element_type=jnp.float32) + bcomb_ref[...]
    h = jnp.maximum(h, 0.0)                                   # [NT, HID]

    # (4) final Linear(hidden, hidden) on target nodes.
    o_ref[...] = (jnp.dot(h, wlin_ref[...], preferred_element_type=jnp.float32)
                  + blin_ref[...]).astype(o_ref.dtype)


# ----------------------------- host-side folding (once per graph/params) -----------------------------

def fold_static(params, alpha, a_norm, a_t_norm, m_sage):
    """One-time constant folding.  Nothing here depends on the node features,
    so it stays out of the per-call path."""
    hid = params["w_lin"].shape[0]
    n_t = a_norm.shape[0]
    f_t = params["w_pre_t"].shape[0]
    f_c = params["w_pre_c"].shape[0]
    f_in = f_t + f_c + 2                      # +2 bias-indicator columns

    # Shared pretransform weight [f_in, hid] (both node types + both biases),
    # replicated block-diagonally so the kernel's first matmul emits a lane-dense
    # [*, 4*hid] intermediate -> no in-kernel slicing / concat.
    wpre = jnp.concatenate([params["w_pre_t"], params["w_pre_c"],
                            params["b_pre_t"][None, :], params["b_pre_c"][None, :]],
                           axis=0)
    wpre_bd = jnp.zeros((4 * f_in, 4 * hid), jnp.float32)
    for k in range(4):
        wpre_bd = wpre_bd.at[k * f_in:(k + 1) * f_in,
                             k * hid:(k + 1) * hid].set(wpre)

    # Stacked aggregation matrix [n_t, 3*n_t + n_c]: [ A_norm | A_t_norm | M_sage | I ].
    acat = jnp.concatenate([a_norm, a_t_norm, m_sage,
                            jnp.eye(n_t, dtype=jnp.float32)], axis=1)

    # Merged projection weight [4*hid, hid]: alpha / (1-alpha) / 0.5-mean / skip
    # identity folded into the weights, the three biases folded into bcomb.
    wproj = jnp.concatenate([
        0.5 * alpha * params["w_s2d"],
        0.5 * (1.0 - alpha) * params["w_d2s"],
        0.5 * params["w_l"],
        0.5 * params["w_r"] + jnp.eye(hid, dtype=jnp.float32),
    ], axis=0)
    bcomb = (0.5 * (alpha * params["b_s2d"] + (1.0 - alpha) * params["b_d2s"]
                    + params["b_l"])).reshape(1, hid)

    return {"wpre_bd": wpre_bd, "acat": acat, "wproj": wproj, "bcomb": bcomb,
            "w_lin": params["w_lin"], "b_lin": params["b_lin"].reshape(1, hid)}


# ----------------------------- per-call forward (jitted) -----------------------------

@jax.jit
def hetero_forecast_gcn_forward(x_t_raw, x_c_raw, folded):
    """Per-call path: pack raw features into the block-diagonal layout and run
    the single fused pallas_call.  The whole thing is one jitted XLA program."""
    n_t, f_t = x_t_raw.shape
    n_c, f_c = x_c_raw.shape
    hid = folded["w_lin"].shape[0]
    f_in = f_t + f_c + 2
    n_rows = 3 * n_t + n_c                 # fwd | bwd | context | root row blocks

    # Raw features with pretransform biases folded in via indicator columns
    # (col f_t+f_c selects b_pre_t, col f_t+f_c+1 selects b_pre_c).
    xraw_t = jnp.concatenate(
        [x_t_raw, jnp.zeros((n_t, f_c), jnp.float32),
         jnp.ones((n_t, 1), jnp.float32), jnp.zeros((n_t, 1), jnp.float32)], axis=1)
    xraw_c = jnp.concatenate(
        [jnp.zeros((n_c, f_t), jnp.float32), x_c_raw,
         jnp.zeros((n_c, 1), jnp.float32), jnp.ones((n_c, 1), jnp.float32)], axis=1)

    zt = jnp.zeros((n_t, f_in), jnp.float32)
    zc = jnp.zeros((n_c, f_in), jnp.float32)
    xraw_bd = jnp.concatenate([
        jnp.concatenate([xraw_t, zt, zt, zt], axis=1),   # fwd path     (A_norm)
        jnp.concatenate([zt, xraw_t, zt, zt], axis=1),   # bwd path     (A_t_norm)
        jnp.concatenate([zc, zc, xraw_c, zc], axis=1),   # context path (SAGE mean)
        jnp.concatenate([zt, zt, zt, xraw_t], axis=1),   # root / skip path
    ], axis=0)                                           # [n_rows, 4*f_in]

    flops = 2 * (n_rows * (4 * f_in) * (4 * hid)
                 + n_t * n_rows * (4 * hid)
                 + n_t * (4 * hid) * hid
                 + n_t * hid * hid)
    bytes_accessed = 4 * (xraw_bd.size + folded["wpre_bd"].size + folded["acat"].size
                          + folded["wproj"].size + folded["bcomb"].size
                          + folded["w_lin"].size + folded["b_lin"].size + n_t * hid)

    # ---- single fused pallas_call (everything fits in one VMEM block) ----
    # TODO(synk): at real graph scale add a row-tiled grid over target nodes
    # (dimension_semantics=("parallel",)) and cast operands to bfloat16 for v6e/v7x.
    return pl.pallas_call(
        _fused_hetero_dirgnn_kernel,
        out_shape=jax.ShapeDtypeStruct((n_t, hid), jnp.float32),
        in_specs=[pl.BlockSpec(memory_space=pltpu.MemorySpace.VMEM)] * 7,
        out_specs=pl.BlockSpec(memory_space=pltpu.MemorySpace.VMEM),
        cost_estimate=pl.CostEstimate(flops=flops, transcendentals=0,
                                      bytes_accessed=bytes_accessed),
    )(xraw_bd, folded["wpre_bd"], folded["acat"], folded["wproj"],
      folded["bcomb"], folded["w_lin"], folded["b_lin"])


# ----------------------------- plain-JAX glue / reference -----------------------------

def directed_norm_dense(a):
    """Dense version of  D_out^{-1/2} A D_in^{-1/2}  (inf -> 0)."""
    in_deg = a.sum(axis=0)
    out_deg = a.sum(axis=1)
    in_inv = jnp.where(in_deg > 0, in_deg ** -0.5, 0.0)
    out_inv = jnp.where(out_deg > 0, out_deg ** -0.5, 0.0)
    return out_inv[:, None] * a * in_inv[None, :]


def sage_mean_matrix(dst, src, n_dst, n_src):
    m = jnp.zeros((n_dst, n_src), jnp.float32).at[dst, src].add(1.0)
    deg = m.sum(axis=1)
    return m / jnp.where(deg > 0, deg, 1.0)[:, None]


def glorot(key, shape):
    fan_in, fan_out = shape
    limit = (6.0 / (fan_in + fan_out)) ** 0.5
    return jax.random.uniform(key, shape, jnp.float32, -limit, limit)


def reference_forward(x_t_raw, x_c_raw, a_norm, a_t_norm, m_sage, params, alpha):
    xt = jnp.maximum(x_t_raw @ params["w_pre_t"] + params["b_pre_t"], 0.0)
    xc = jnp.maximum(x_c_raw @ params["w_pre_c"] + params["b_pre_c"], 0.0)
    out_dir = alpha * ((a_norm @ xt) @ params["w_s2d"] + params["b_s2d"]) \
        + (1.0 - alpha) * ((a_t_norm @ xt) @ params["w_d2s"] + params["b_d2s"])
    out_sage = (m_sage @ xc) @ params["w_l"] + params["b_l"] + xt @ params["w_r"]
    h = jnp.maximum(0.5 * (out_dir + out_sage) + xt, 0.0)
    return h @ params["w_lin"] + params["b_lin"]


# ----------------------------- main -----------------------------

if __name__ == "__main__":
    key = jax.random.PRNGKey(0)
    N_T, N_C = 16, 8          # number of target / context nodes
    F_T, F_C = 12, 6          # raw input feature dims per node type
    HID = 32                  # hidden_channels
    ALPHA = 0.5

    ks = jax.random.split(key, 16)

    # raw node features
    x_target = jax.random.normal(ks[0], (N_T, F_T), jnp.float32)
    x_context = jax.random.normal(ks[1], (N_C, F_C), jnp.float32)

    # ('target','to','target') edges: ring + skip-3 ring
    rows = jnp.concatenate([jnp.arange(N_T), jnp.arange(N_T)])
    cols = jnp.concatenate([(jnp.arange(N_T) + 1) % N_T, (jnp.arange(N_T) + 3) % N_T])
    adj_tt = jnp.zeros((N_T, N_T), jnp.float32).at[rows, cols].set(1.0)
    a_norm = directed_norm_dense(adj_tt)        # DirGNNConv conv "fwd" normalized adjacency
    a_t_norm = directed_norm_dense(adj_tt.T)    # DirGNNConv conv on flipped edges

    # ('context','to','target') edges: context j -> targets 2j, 2j+1
    c_src = jnp.concatenate([jnp.arange(N_C), jnp.arange(N_C)])
    c_dst = jnp.concatenate([2 * jnp.arange(N_C), 2 * jnp.arange(N_C) + 1])
    m_sage = sage_mean_matrix(c_dst, c_src, N_T, N_C)

    # deterministic parameters (shapes follow the module's __init__)
    params = {
        # HeteroDictLinear (per node type, -1 -> hidden)
        "w_pre_t": glorot(ks[2], (F_T, HID)), "b_pre_t": jnp.zeros((HID,), jnp.float32),
        "w_pre_c": glorot(ks[3], (F_C, HID)), "b_pre_c": jnp.zeros((HID,), jnp.float32),
        # DirGNNConv: lin_src_to_dst / lin_dst_to_src (hidden -> hidden)
        "w_s2d": glorot(ks[4], (HID, HID)), "b_s2d": 0.01 * jnp.ones((HID,), jnp.float32),
        "w_d2s": glorot(ks[5], (HID, HID)), "b_d2s": -0.01 * jnp.ones((HID,), jnp.float32),
        # SAGEConv: lin_l (with bias), lin_r (no bias)
        "w_l": glorot(ks[6], (HID, HID)), "b_l": jnp.zeros((HID,), jnp.float32),
        "w_r": glorot(ks[7], (HID, HID)),
        # final Linear(hidden, hidden)
        "w_lin": glorot(ks[8], (HID, HID)), "b_lin": 0.02 * jnp.ones((HID,), jnp.float32),
    }

    # one-time constant folding (graph + params), then the jitted fused forward
    folded = fold_static(params, ALPHA, a_norm, a_t_norm, m_sage)
    out = hetero_forecast_gcn_forward(x_target, x_context, folded)
    out = jax.block_until_ready(out)

    ref = reference_forward(x_target, x_context, a_norm, a_t_norm, m_sage, params, ALPHA)
    assert out.shape == (N_T, HID)
    assert jnp.allclose(out, ref, atol=1e-4, rtol=1e-4), "mismatch vs reference"

    print("KERNEL_OK")
</pallas_src>

<mosaic_0001>
module attributes {stable_mosaic.version = 11 : i64} {
  func.func @_fused_hetero_dirgnn_kernel(%arg0: memref<56x80xf32, #tpu.memory_space<vmem>>, %arg1: memref<80x128xf32, #tpu.memory_space<vmem>>, %arg2: memref<16x56xf32, #tpu.memory_space<vmem>>, %arg3: memref<128x32xf32, #tpu.memory_space<vmem>>, %arg4: memref<1x32xf32, #tpu.memory_space<vmem>>, %arg5: memref<32x32xf32, #tpu.memory_space<vmem>>, %arg6: memref<1x32xf32, #tpu.memory_space<vmem>>, %arg7: memref<16x32xf32, #tpu.memory_space<vmem>>) attributes {dimension_semantics = [], scalar_prefetch = 0 : i64, scratch_operands = 0 : i64, tpu.core_type = #tpu.core_type<tc>} {
    %c0 = arith.constant 0 : index
    %c0_0 = arith.constant 0 : index
    %0 = vector.load %arg0[%c0, %c0_0] : memref<56x80xf32, #tpu.memory_space<vmem>>, vector<56x80xf32>
    %c0_1 = arith.constant 0 : index
    %c0_2 = arith.constant 0 : index
    %1 = vector.load %arg1[%c0_1, %c0_2] : memref<80x128xf32, #tpu.memory_space<vmem>>, vector<80x128xf32>
    %cst = arith.constant dense<0.000000e+00> : vector<56x128xf32>
    %2 = tpu.matmul %0, %1, %cst {dimension_numbers = #tpu.dot_dimension_numbers<[1], [0], [0], [1], [0, 0, 1, 1], [], []>} : vector<56x80xf32>, vector<80x128xf32>, vector<56x128xf32> -> vector<56x128xf32>
    %cst_3 = arith.constant 0.000000e+00 : f32
    %3 = vector.broadcast %cst_3 : f32 to vector<56x128xf32>
    %4 = arith.maximumf %2, %3 : vector<56x128xf32>
    %c0_4 = arith.constant 0 : index
    %c0_5 = arith.constant 0 : index
    %5 = vector.load %arg2[%c0_4, %c0_5] : memref<16x56xf32, #tpu.memory_space<vmem>>, vector<16x56xf32>
    %cst_6 = arith.constant dense<0.000000e+00> : vector<16x128xf32>
    %6 = tpu.matmul %5, %4, %cst_6 {dimension_numbers = #tpu.dot_dimension_numbers<[1], [0], [0], [1], [0, 0, 1, 1], [], []>} : vector<16x56xf32>, vector<56x128xf32>, vector<16x128xf32> -> vector<16x128xf32>
    %c0_7 = arith.constant 0 : index
    %c0_8 = arith.constant 0 : index
    %7 = vector.load %arg3[%c0_7, %c0_8] : memref<128x32xf32, #tpu.memory_space<vmem>>, vector<128x32xf32>
    %cst_9 = arith.constant dense<0.000000e+00> : vector<16x32xf32>
    %8 = tpu.matmul %6, %7, %cst_9 {dimension_numbers = #tpu.dot_dimension_numbers<[1], [0], [0], [1], [0, 0, 1, 1], [], []>} : vector<16x128xf32>, vector<128x32xf32>, vector<16x32xf32> -> vector<16x32xf32>
    %c0_10 = arith.constant 0 : index
    %c0_11 = arith.constant 0 : index
    %9 = vector.load %arg4[%c0_10, %c0_11] : memref<1x32xf32, #tpu.memory_space<vmem>>, vector<1x32xf32>
    %10 = vector.broadcast %9 : vector<1x32xf32> to vector<16x32xf32>
    %11 = arith.addf %8, %10 : vector<16x32xf32>
    %cst_12 = arith.constant 0.000000e+00 : f32
    %12 = vector.broadcast %cst_12 : f32 to vector<16x32xf32>
    %13 = arith.maximumf %11, %12 : vector<16x32xf32>
    %c0_13 = arith.constant 0 : index
    %c0_14 = arith.constant 0 : index
    %14 = vector.load %arg5[%c0_13, %c0_14] : memref<32x32xf32, #tpu.memory_space<vmem>>, vector<32x32xf32>
    %cst_15 = arith.constant dense<0.000000e+00> : vector<16x32xf32>
    %15 = tpu.matmul %13, %14, %cst_15 {dimension_numbers = #tpu.dot_dimension_numbers<[1], [0], [0], [1], [0, 0, 1, 1], [], []>} : vector<16x32xf32>, vector<32x32xf32>, vector<16x32xf32> -> vector<16x32xf32>
    %c0_16 = arith.constant 0 : index
    %c0_17 = arith.constant 0 : index
    %16 = vector.load %arg6[%c0_16, %c0_17] : memref<1x32xf32, #tpu.memory_space<vmem>>, vector<1x32xf32>
    %17 = vector.broadcast %16 : vector<1x32xf32> to vector<16x32xf32>
    %18 = arith.addf %15, %17 : vector<16x32xf32>
    %c0_18 = arith.constant 0 : index
    %c0_19 = arith.constant 0 : index
    %19 = vector.load %arg7[%c0_18, %c0_19] : memref<16x32xf32, #tpu.memory_space<vmem>>, vector<16x32xf32>
    tpu.vector_store %arg7[%c0_18, %c0_19], %18 {strides = array<i32>} : memref<16x32xf32, #tpu.memory_space<vmem>>, vector<16x32xf32>,
    return
  }
}

</mosaic_0001>

<bundles_post_ra>
// kernel: hetero_forecast_gcn_forward.1
= control target key start
LH: loop header
LB: loop body
LE: loop exit
PB: predicated region body
PF: predicated region fallthrough
CT: control target
= control target key end

     0   :  { %v732_v3 = vmov 0.0|0.0   ;;  %vm733_vm0 = vmmov 0   ;;  %v734_v6 = vmov 0.0   ;;  %s929_s0 = inlined_call_operand.vmem [shape: f32[56,80], index: 0, kind: input, shape index: {}]   ;;  %s930_s1 = inlined_call_operand.vmem [shape: f32[80,128], index: 1, kind: input, shape index: {}]   ;;  %s931_s2 = inlined_call_operand.vmem [shape: f32[16,56], index: 2, kind: input, shape index: {}]   ;;  %s932_s3 = inlined_call_operand.vmem [shape: f32[128,32], index: 3, kind: input, shape index: {}]   ;;  %s933_s4 = inlined_call_operand.vmem [shape: f32[1,32], index: 4, kind: input, shape index: {}]   ;;  %s934_s5 = inlined_call_operand.vmem [shape: f32[32,32], index: 5, kind: input, shape index: {}]   ;;  %s935_s6 = inlined_call_operand.vmem [shape: f32[1,32], index: 6, kind: input, shape index: {}]   ;;  %s936_s7 = inlined_call_operand.hbm [shape: f32[16,32], index: 7, kind: output, shape index: {}]  }
   0x1   :  { %v34_v0 = vld [vmem:[%s930_s1] sm:$0xff]  ;;  %v35_v1 = vld [vmem:[%s930_s1 + $0x8] sm:$0xff]  ;;  %v36_v2 = vld [vmem:[%s930_s1 + $0x10] sm:$0xff]  ;;  %635 = vmatprep.subr.bf16.mxu0 %v732_v3  ;;  %551 = vmatprep.mubr.msk.f32.mxu0 %vm733_vm0, %v734_v6 }
   0x2   :  { %v636_v4 = vpack.c.bf16 %v35_v1, %v34_v0  ;;  %v37_v5 = vld [vmem:[%s930_s1 + $0x18] sm:$0xff]  ;;  %v38_v8 = vld [vmem:[%s930_s1 + $0x20] sm:$0xff]  ;;  %v39_v9 = vld [vmem:[%s930_s1 + $0x28] sm:$0xff] }
   0x3   :  { %v639_v7 = vpack.c.bf16 %v37_v5, %v36_v2 }
   0x4   :  { %637 = vmatpush3.bf16.msra.mxu0 %v636_v4 }
   0x5   :  { %638 = vmatprep.subr.bf16.mxu0 %v732_v3 }
   0x6   :  { %12 = vsyncpa [#allocation3], 0  ;;  %v642_v10 = vpack.c.bf16 %v39_v9, %v38_v8  ;;  %v40_v11 = vld [vmem:[%s930_s1 + $0x30] sm:$0xff]  ;;  %v41_v12 = vld [vmem:[%s930_s1 + $0x38] sm:$0xff]  ;;  %vm44_vm1 = vcmask 654336   ;;  %vm175_vm2 = vcmask 457728  }
   0x7   :  { %v645_v13 = vpack.c.bf16 %v41_v12, %v40_v11  ;;  %v42_v14 = vld [vmem:[%s930_s1 + $0x40] sm:$0xff]  ;;  %v43_v15 = vld [vmem:[%s930_s1 + $0x48] sm:$0xff]  ;;  %v29_v19 = vld [vmem:[%s929_s0 + $0x10] sm:$0xff]  ;;  %vm368_vm3 = vcmask 261120   ;;  %s735_s28 = smov [#allocation2]  }
   0x8   :  { %640 = vmatpush3.bf16.msra.mxu0 %v639_v7  ;;  %v648_v16 = vpack.c.bf16 %v43_v15, %v42_v14  ;;  %v27_v17 = vld [vmem:[%s929_s0] sm:$0xff]  ;;  %v28_v18 = vld [vmem:[%s929_s0 + $0x8] sm:$0xff]  ;;  %v30_v20 = vld [vmem:[%s929_s0 + $0x18] sm:$0xff]  ;;  %s457_s29 = sshll.u32 %s735_s28, 4  ;;  %s458_s29 = int_to_ptr.vmem [resolvable:$true] %s457_s29 }
   0x9   :  { %641 = vmatprep.subr.bf16.mxu0 %v732_v3  ;;  %v31_v21 = vld [vmem:[%s929_s0 + $0x20] sm:$0xff]  ;;  %v32_v22 = vld [vmem:[%s929_s0 + $0x28] sm:$0xff]  ;;  %v33_v23 = vld [vmem:[%s929_s0 + $0x30] sm:$0xff]  ;;  %p713_p1 = scmp.lt.s32.totalorder %s458_s29, %s458_s29 }
   0xa   :  { %v173_v24 = vld [vmem:[%s931_s2] sm:$0xff]  ;;  %v258_v48 = vld [vmem:[%s932_s3 + $0x8] sm:$0xff]  ;;  %v259_v51 = vld [vmem:[%s932_s3 + $0x10] sm:$0xff] }
   0xb   :  { %586 = vmatprep.mubr.msk.f32.mxu1 %vm175_vm2, %v173_v24  ;;  %v257_v47 = vld [vmem:[%s932_s3] sm:$0xff]  ;;  %v260_v52 = vld [vmem:[%s932_s3 + $0x18] sm:$0xff]  ;;  %v174_v54 = vld [vmem:[%s931_s2 + $0x8] sm:$0xff] }
   0xc   :  { %643 = vmatpush3.bf16.msra.mxu0 %v642_v10  ;;  %v662_v53 = vpack.c.bf16 %v258_v48, %v257_v47  ;;  %v666_v55 = vpack.c.bf16 %v260_v52, %v259_v51  ;;  %v261_v56 = vld [vmem:[%s932_s3 + $0x20] sm:$0xff]  ;;  %v262_v57 = vld [vmem:[%s932_s3 + $0x28] sm:$0xff]  ;;  %v263_v59 = vld [vmem:[%s932_s3 + $0x30] sm:$0xff] }
   0xd   :  { %644 = vmatprep.subr.bf16.mxu0 %v732_v3  ;;  %v670_v58 = vpack.c.bf16 %v262_v57, %v261_v56  ;;  %v264_v60 = vld [vmem:[%s932_s3 + $0x38] sm:$0xff]  ;;  %v265_v62 = vld [vmem:[%s932_s3 + $0x40] sm:$0xff]  ;;  %v266_v63 = vld [vmem:[%s932_s3 + $0x48] sm:$0xff] }
   0xe   :  { %v674_v61 = vpack.c.bf16 %v264_v60, %v263_v59  ;;  %v678_v0 = vpack.c.bf16 %v266_v63, %v265_v62  ;;  %v267_v1 = vld [vmem:[%s932_s3 + $0x50] sm:$0xff]  ;;  %v268_v2 = vld [vmem:[%s932_s3 + $0x58] sm:$0xff]  ;;  %v269_v4 = vld [vmem:[%s932_s3 + $0x60] sm:$0xff] }
   0xf   :  { %v270_v5 = vld [vmem:[%s932_s3 + $0x68] sm:$0xff]  ;;  %v271_v7 = vld [vmem:[%s932_s3 + $0x70] sm:$0xff]  ;;  %v272_v8 = vld [vmem:[%s932_s3 + $0x78] sm:$0xff] }
  0x10   :  { %646 = vmatpush3.bf16.msra.mxu0 %v645_v13  ;;  %v690_v9 = vpack.c.bf16 %v272_v8, %v271_v7  ;;  %v357_v10 = vld [vmem:[%s934_s5] sm:$0xff]  ;;  %v358_v11 = vld [vmem:[%s934_s5 + $0x8] sm:$0xff]  ;;  %v359_v12 = vld [vmem:[%s934_s5 + $0x10] sm:$0xff] }
  0x11   :  { %647 = vmatprep.subr.bf16.mxu0 %v732_v3  ;;  %v682_v3 = vpack.c.bf16 %v268_v2, %v267_v1  ;;  %v694_v13 = vpack.c.bf16 %v358_v11, %v357_v10  ;;  %v360_v14 = vld [vmem:[%s934_s5 + $0x18] sm:$0xff] }
  0x12   :  { %v698_v15 = vpack.c.bf16 %v360_v14, %v359_v12 }
  0x14   :  { %649 = vmatpush3.bf16.msra.mxu0 %v648_v16 }
  0x15   :  { %695 = vmatprep.subr.bf16.mxu0 %v694_v13 }
  0x17   :  { %552 = vmatmul.mubr.msk.f32.vlgmr.msra.gmra.mrb[0].mxu0 %vm44_vm1, %v27_v17 }
  0x18   :  { %554 = vmatprep.mubr.msk.f32.mxu0 %vm733_vm0, %v734_v6  ;;  %697 = vmatpush3.bf16.msra.mxu0 %v694_v13 }
  0x19   :  { %699 = vmatprep.subr.bf16.mxu0 %v698_v15 }
  0x1b   :  { %555 = vmatmul.mubr.msk.f32.gmra.mrb[2].mxu0 %vm44_vm1, %v28_v18  ;;  %v477_v18 = vld [vmem:[%s933_s4] ss:$0 sm:$0xff]  ;;  %s708_s4 = scalar_lea.vmem %s458_s29, 256 }
  0x1c   :  { %557 = vmatprep.mubr.msk.f32.mxu0 %vm733_vm0, %v734_v6  ;;  %701 = vmatpush3.bf16.msra.mxu0 %v698_v15  ;;  %p709_p0 = scmp.ne.s32.totalorder %s458_s29, %s708_s4  ;;  %p714_p2 = scmp.lt.s32.totalorder %s708_s4, %s708_s4 }
  0x1e   :  { %p715_p3 = por %p714_p2, %p713_p1 }
  0x1f   :  { %558 = vmatmul.mubr.msk.f32.gmra.mrb[4].mxu0 %vm44_vm1, %v29_v19 }
  0x20   :  { %560 = vmatprep.mubr.msk.f32.mxu0 %vm733_vm0, %v734_v6  ;;  %p716_p4 = pnand %p715_p3, %p709_p0 }
  0x23   :  { %561 = vmatmul.mubr.msk.f32.gmra.mrb[6].mxu0 %vm44_vm1, %v30_v20 }
  0x24   :  { %563 = vmatprep.mubr.msk.f32.mxu0 %vm733_vm0, %v734_v6 }
  0x27   :  { %564 = vmatmul.mubr.msk.f32.gmra.mrb[8].mxu0 %vm44_vm1, %v31_v21 }
  0x28   :  { %566 = vmatprep.mubr.msk.f32.mxu0 %vm733_vm0, %v734_v6 }
  0x2b   :  { %567 = vmatmul.mubr.msk.f32.gmra.mrb[10].mxu0 %vm44_vm1, %v32_v22 }
  0x2c   :  { %569 = vmatprep.mubr.msk.f32.mxu0 %vm733_vm0, %v734_v6  ;;  %v686_v6 = vpack.c.bf16 %v270_v5, %v269_v4 }
  0x2f   :  { %570 = vmatmul.mubr.msk.f32.gmra.mrb[12].mxu0 %vm44_vm1, %v33_v23 }
  0xea   :  { %v132_v25 = vpop.f32.mrb[0].mxu0 }
  0xeb   :  { %v553_v26 = vpop.f32.mrb[1].mxu0  ;;  %v166_v28 = vmax.f32 %v132_v25, 0.0  ;;  %v478_v25 = vld [vmem:[%s935_s6] ss:$0 sm:$0xff] }
  0xee   :  { %v137_v27 = vpop.f32.mrb[2].mxu0 }
  0xef   :  { %v167_v29 = vmax.f32 %v137_v27, 0.0  ;;  %v556_v30 = vpop.f32.mrb[3].mxu0 }
  0xf1   :  { %v650_v31 = vpack.c.bf16 %v167_v29, %v166_v28 }
  0xf2   :  { %v142_v32 = vpop.f32.mrb[4].mxu0 }
  0xf3   :  { %v559_v33 = vpop.f32.mrb[5].mxu0  ;;  %651 = vmatprep.subr.bf16.mxu1 %v650_v31  ;;  %v168_v35 = vmax.f32 %v142_v32, 0.0 }
  0xf4   :  { %653 = vmatpush3.bf16.msra.mxu1 %v650_v31 }
  0xf6   :  { %v147_v34 = vpop.f32.mrb[6].mxu0 }
  0xf7   :  { %v169_v36 = vmax.f32 %v147_v34, 0.0  ;;  %v562_v37 = vpop.f32.mrb[7].mxu0 }
  0xf9   :  { %v654_v38 = vpack.c.bf16 %v169_v36, %v168_v35 }
  0xfa   :  { %v152_v39 = vpop.f32.mrb[8].mxu0 }
  0xfb   :  { %v565_v40 = vpop.f32.mrb[9].mxu0  ;;  %655 = vmatprep.subr.bf16.mxu1 %v654_v38  ;;  %v170_v42 = vmax.f32 %v152_v39, 0.0 }
  0xfc   :  { %657 = vmatpush3.bf16.msra.mxu1 %v654_v38 }
  0xfe   :  { %v157_v41 = vpop.f32.mrb[10].mxu0 }
  0xff   :  { %v171_v43 = vmax.f32 %v157_v41, 0.0  ;;  %v568_v44 = vpop.f32.mrb[11].mxu0 }
 0x101   :  { %v658_v45 = vpack.c.bf16 %v171_v43, %v170_v42 }
 0x102   :  { %v162_v46 = vpop.f32.mrb[12].mxu0 }
 0x103   :  { %v172_v49 = vmax.f32 %v162_v46, 0.0  ;;  %659 = vmatprep.subr.bf16.mxu1 %v658_v45  ;;  %v571_v50 = vpop.f32.mrb[13].mxu0 }
 0x104   :  { %661 = vmatpush3.bf16.msra.mxu1 %v658_v45 }
 0x105   :  { %584 = vmatprep.subr.mxu1 %v172_v49 }
 0x108   :  { %585 = vmatpush3.msra.mxu1 %v172_v49 }
 0x109   :  { %587 = vmatmul.mubr.msk.f32.vlgmr.msra.gmra.mrb[0].mxu1 %vm175_vm2, %v174_v54  ;;  %663 = vmatprep.subr.bf16.mxu1 %v662_v53 }
 0x10a   :  { %665 = vmatpush3.bf16.msra.mxu1 %v662_v53 }
 0x10b   :  { %667 = vmatprep.subr.bf16.mxu1 %v666_v55 }
 0x10e   :  { %669 = vmatpush3.bf16.msra.mxu1 %v666_v55 }
 0x10f   :  { %671 = vmatprep.subr.bf16.mxu1 %v670_v58 }
 0x112   :  { %673 = vmatpush3.bf16.msra.mxu1 %v670_v58 }
 0x113   :  { %675 = vmatprep.subr.bf16.mxu1 %v674_v61 }
 0x116   :  { %677 = vmatpush3.bf16.msra.mxu1 %v674_v61 }
 0x117   :  { %679 = vmatprep.subr.bf16.mxu1 %v678_v0 }
 0x11a   :  { %681 = vmatpush3.bf16.msra.mxu1 %v678_v0 }
 0x11b   :  { %683 = vmatprep.subr.bf16.mxu1 %v682_v3 }
 0x11e   :  { %685 = vmatpush3.bf16.msra.mxu1 %v682_v3 }
 0x11f   :  { %687 = vmatprep.subr.bf16.mxu1 %v686_v6 }
 0x122   :  { %689 = vmatpush3.bf16.msra.mxu1 %v686_v6 }
 0x123   :  { %691 = vmatprep.subr.bf16.mxu1 %v690_v9 }
 0x126   :  { %693 = vmatpush3.bf16.msra.mxu1 %v690_v9 }
 0x1dc   :  { %v588_v16 = vpop.f32.mrb[0].mxu1 }
 0x1dd   :  { %v248_v17 = vpop.f32.mrb[1].mxu1 }
 0x1de   :  { %621 = vmatprep.mubr.f32.mxu1 %v248_v17 }
 0x1df   :  { %622 = vmatmul.mubr.f32.vlgmr.msra.gmra.mrb[2].mxu1 %v588_v16 }
 0x2b2   :  { %v623_v19 = vpop.f32.mrb[2].mxu1 }
 0x2b3   :  { %v352_v20 = vadd.f32 %v623_v19, %v477_v18  ;;  %v346_v21 = vpop.f32.mrb[3].mxu1 }
 0x2b4   :  { %v347_v22 = vadd.f32 %v477_v18, %v346_v21 }
 0x2b5   :  { %v356_v24 = vmax.f32 %v352_v20, 0.0 }
 0x2b6   :  { %v355_v23 = vmax.f32 %v347_v22, 0.0 }
 0x2b8   :  { %632 = vmatprep.mubr.msk.f32.mxu0 %vm368_vm3, %v355_v23 }
 0x2b9   :  { %633 = vmatmul.mubr.msk.f32.vlgmr.msra.gmra.mrb[14].mxu0 %vm368_vm3, %v356_v24 }
 0x38c   :  { %v634_v26 = vpop.f32.mrb[14].mxu0 }
 0x38d   :  { %v447_v27 = vadd.f32 %v634_v26, %v478_v25  ;;  %v441_v28 = vpop.f32.mrb[15].mxu0 }
 0x38e   :  { %v442_v29 = vadd.f32 %v478_v25, %v441_v28 }
 0x38f   :  { %451 = vst.msk [vmem:[#allocation2 + $0x8] sm:$0xff] %vm368_vm3, %v447_v27 }
 0x390   :  { %450 = vst.msk [vmem:[#allocation2] sm:$0xff] %vm368_vm3, %v442_v29 }
 0x391   :  { %719 = shalt.err (!%p716_p4)
}
 0x392   :  { %s720_s6 = scalar_lea.hbm %s936_s7, 256 }
 0x393   :  { %p721_p5 = scmp.ne.s32.totalorder %s936_s7, %s720_s6  ;;  %p724_p6 = scmp.lt.u32.totalorder %s720_s6, %s936_s7 }
 0x395   :  { %p726_p7 = pnand %p724_p6, %p721_p5 }
 0x397   :  { %729 = shalt.err (!%p726_p7)
}
 0x398   :  { %s736_s0 = smov 128   ;;  %s737_s13 = smov 8  }
 0x399   :  { %463 = dma.vmem_to_hbm [thread:$0]  %s458_s29, 256, %s936_s7, [#allocation3], %s736_s0, %s736_s0, %s737_s13  }
 0x39a   :  { %730 = dma.done.wait [#allocation3], 256  }
 0x39b   :  { %731 = vsyncadd [#allocation3], 4294967040 }
 0x39c   :  { %467 = vsyncpa [#allocation3], 1 }

</bundles_post_ra>
